<compile_context>
chip_gen: v6e
topology: v6e:2x2x1
jax: 0.10.0
libtpu: 0.0.40
codegen_flags: <defaults>
</compile_context>

<pallas_src>
import functools
import math

import jax
import jax.numpy as jnp
import numpy as np
from jax.experimental import pallas as pl
from jax.experimental.pallas import tpu as pltpu

_LANE = 128
_SUBLANE = 8
_MAX_BLOCK_ROWS = 4096          # (4096,128) f32 = 2 MiB per array per buffer
_SMALL_BYTES = 256 * 1024       # below this, XLA fusion beats a Pallas launch

_ELEMENTWISE_CACHE = {}


@functools.lru_cache(maxsize=1)
def _tpu_config():
    """Best-effort (VMEM bytes per TensorCore, TensorCores per chip)."""
    vmem_bytes = 64 * 1024 * 1024           # conservative floor (v7x)
    num_cores = 1
    kind = ""
    try:
        kind = jax.devices()[0].device_kind.lower()
    except Exception:
        pass
    try:
        info = pltpu.get_tpu_info()
        v = getattr(info, "vmem_capacity_bytes", None)
        if v:
            vmem_bytes = int(v)
    except Exception:
        if kind and "v7" not in kind:
            vmem_bytes = 128 * 1024 * 1024  # v5e / v6e
    if "v7" in kind:
        num_cores = 2                       # two TensorCores per chip
        vmem_bytes = min(vmem_bytes, 64 * 1024 * 1024)
    return vmem_bytes, num_cores


def _probe_elementwise(expression_fn, xs):
    """Tiny eager value probe: does expression_fn commute with flattening?

    Shape-preserving but cross-element fns (softmax/cumsum/flip over an axis)
    give different values once the probe is flattened, so they are rejected
    and fall back to the direct path.
    """
    key = (id(expression_fn),
           tuple((tuple(x.shape), str(np.dtype(x.dtype))) for x in xs))
    cached = _ELEMENTWISE_CACHE.get(key)
    if cached is not None:
        return cached
    ok = False
    try:
        probes = []
        for x in xs:
            shape = tuple(min(int(d), 3) for d in x.shape)
            size = max(1, math.prod(shape)) if shape else 1
            base = jnp.arange(1, size + 1, dtype=jnp.float32)
            if np.issubdtype(np.dtype(x.dtype), np.floating):
                base = base / jnp.float32(size + 1)   # distinct values in (0,1)
            probes.append(base.reshape(shape).astype(x.dtype))
        ref = expression_fn(*probes)
        if getattr(ref, "shape", None) == probes[0].shape:
            flat_shape = (1, max(1, math.prod(probes[0].shape)))
            flat = expression_fn(*[p.reshape(flat_shape) for p in probes])
            r = np.asarray(jnp.asarray(ref, jnp.float32)).reshape(-1)
            f = np.asarray(jnp.asarray(flat, jnp.float32)).reshape(-1)
            ok = bool(np.allclose(r, f, rtol=1e-3, atol=1e-3))
    except Exception:
        ok = False
    _ELEMENTWISE_CACHE[key] = ok
    return ok


def _make_expression_kernel(expression_fn, n_inputs, compute_dtype):
    """Kernel body: apply expression_fn on the VMEM tiles."""

    def kernel(*refs):
        in_refs = refs[:n_inputs]
        out_ref = refs[n_inputs]
        if compute_dtype is None:
            vals = tuple(r[...] for r in in_refs)
        else:
            # Opt-in upcast (mainly for bf16 on v5e, whose VPU/EUP lack bf16).
            vals = tuple(r[...].astype(compute_dtype) for r in in_refs)
        out_ref[...] = expression_fn(*vals).astype(out_ref.dtype)

    return kernel


def _choose_block_rows(rows, bytes_per_row, budget, packing, min_steps):
    """Pick a big, packing-aligned block height within the VMEM budget."""
    if rows <= packing:
        return rows
    # Default BlockSpec pipelining double-buffers every array.
    vmem_rows = max(packing, budget // (2 * bytes_per_row))
    target_rows = max(packing, pl.cdiv(rows, max(1, min_steps)))
    block_rows = min(_MAX_BLOCK_ROWS, vmem_rows, target_rows, rows)
    block_rows = max(packing, (block_rows // packing) * packing)
    return min(block_rows, rows)


def expression_forward(expression_fn, *xs, compute_dtype=None,
                       donate_input=False, elementwise=None):
    """Pallas-accelerated equivalent of Expression(expression_fn).forward(*xs)."""
    if not xs:
        return expression_fn()

    try:
        orig_shape = tuple(xs[0].shape)
        same_shape = all(tuple(x.shape) == orig_shape for x in xs)
        dtypes = [np.dtype(x.dtype) for x in xs]
    except Exception:
        return expression_fn(*xs)

    if elementwise is False or not same_shape:
        return expression_fn(*xs)

    # The fast path needs a single, shape-preserving array output.
    try:
        out_aval = jax.eval_shape(
            expression_fn, *[jax.ShapeDtypeStruct(x.shape, x.dtype) for x in xs])
    except Exception:
        return expression_fn(*xs)
    if (not isinstance(out_aval, jax.ShapeDtypeStruct)
            or tuple(out_aval.shape) != orig_shape):
        return expression_fn(*xs)
    out_dtype = np.dtype(out_aval.dtype)

    n = math.prod(orig_shape) if orig_shape else 1
    itemsizes = [d.itemsize for d in dtypes] + [out_dtype.itemsize]

    # Small-tensor fallback: Pallas launch + ~0.35us/step dominates below
    # ~256 KiB; XLA's native elementwise fusion handles these better.
    if n * max(itemsizes) < _SMALL_BYTES:
        return expression_fn(*xs)

    # Elementwise semantics are required once we flatten to (rows, 128) tiles.
    if elementwise is None and not _probe_elementwise(expression_fn, xs):
        return expression_fn(*xs)

    vmem_bytes, num_cores = _tpu_config()
    vmem_limit = int(min(vmem_bytes // 2, 64 * 1024 * 1024))   # 32 MiB on v7x
    block_budget = (vmem_limit * 5) // 8                       # ~20/40 MiB

    # Sub-32-bit dtypes pack along sublanes: keep blocks packing-aligned
    # (8 rows for 32-bit, 16 for bf16/fp16, 32 for int8/fp8).
    packing = max(_SUBLANE, 32 // min(itemsizes))

    bulk = (n // _LANE) * _LANE        # lane-aligned bulk -> Pallas
    tail = n - bulk                    # <128-element tail -> plain XLA
    rows = bulk // _LANE

    flats = [x.reshape(-1) for x in xs]
    if tail:
        xs2d = [f[:bulk].reshape(rows, _LANE) for f in flats]
    else:
        xs2d = [f.reshape(rows, _LANE) for f in flats]

    bytes_per_row = _LANE * sum(itemsizes)
    min_steps = 2 * num_cores if num_cores > 1 else 1
    block_rows = _choose_block_rows(rows, bytes_per_row, block_budget,
                                    packing, min_steps)

    steps = pl.cdiv(rows, block_rows)
    if num_cores > 1 and steps > 1 and steps % num_cores:
        # Balance the two TensorCores (v7x): make the step count a multiple of
        # the core count by shrinking the block a little (best effort).
        want = pl.cdiv(steps, num_cores) * num_cores
        br = pl.cdiv(rows, want)
        br = max(packing, pl.cdiv(br, packing) * packing)
        block_rows = min(block_rows, br)
        steps = pl.cdiv(rows, block_rows)

    kernel = _make_expression_kernel(expression_fn, len(xs), compute_dtype)

    # Advisory cost estimate for XLA's scheduler.
    try:
        cost = pl.estimate_cost(
            expression_fn,
            *[jax.ShapeDtypeStruct((rows, _LANE), d) for d in dtypes])
    except Exception:
        cost = pl.CostEstimate(
            flops=2 * rows * _LANE * len(xs),
            transcendentals=0,
            bytes_accessed=rows * _LANE * sum(itemsizes))

    io_aliases = {}
    if donate_input and len(xs) == 1 and dtypes[0] == out_dtype and tail == 0:
        # Opt-in: reuse the input HBM buffer for the output (footprint only).
        io_aliases = {0: 0}

    out2d = pl.pallas_call(
        kernel,
        out_shape=jax.ShapeDtypeStruct((rows, _LANE), out_dtype),
        grid=(steps,),
        in_specs=[pl.BlockSpec((block_rows, _LANE), lambda i: (i, 0))
                  for _ in xs2d],
        out_specs=pl.BlockSpec((block_rows, _LANE), lambda i: (i, 0)),
        compiler_params=pltpu.CompilerParams(
            dimension_semantics=("parallel",),
            vmem_limit_bytes=vmem_limit,
        ),
        cost_estimate=cost,
        input_output_aliases=io_aliases,
    )(*xs2d)

    out_flat = out2d.reshape(-1)
    if tail:
        tail_ins = [f[bulk:] for f in flats]
        if compute_dtype is not None:
            tail_ins = [t.astype(compute_dtype) for t in tail_ins]
        tail_out = expression_fn(*tail_ins).astype(out_dtype)
        out_flat = jnp.concatenate([out_flat, tail_out.reshape(-1)])
    return out_flat.reshape(orig_shape)


class Expression:
    """JAX/Pallas mirror of the PyTorch Expression module."""

    def __init__(self, expression_fn, compute_dtype=None, donate_input=False,
                 elementwise=None):
        self.expression_fn = expression_fn
        self.compute_dtype = compute_dtype
        self.donate_input = donate_input
        self.elementwise = elementwise   # True: opt-in; False: never; None: probe

    def __call__(self, *x):
        return expression_forward(
            self.expression_fn,
            *x,
            compute_dtype=self.compute_dtype,
            donate_input=self.donate_input,
            elementwise=self.elementwise,
        )

    def __repr__(self):
        if hasattr(self.expression_fn, "func") and hasattr(self.expression_fn, "kwargs"):
            expression_str = "{:s} {:s}".format(
                self.expression_fn.func.__name__, str(self.expression_fn.kwargs)
            )
        else:
            expression_str = getattr(
                self.expression_fn, "__name__", str(self.expression_fn)
            )
        return self.__class__.__name__ + "(expression=" + expression_str + ")"


# --- example expression_fns (as used in braindecode-style hybrid models) ----
def square(x):
    return x * x


def safe_log_of_square(x):
    # Expression(square) followed by Expression(safe_log), fused.
    return jnp.log(jnp.maximum(x * x, 1e-6))


def scaled_residual_add(a, b):
    # variadic example: forward(*x) with two inputs
    return a * b + 0.5 * a


if __name__ == "__main__":
    key = jax.random.PRNGKey(0)
    k1, k2, k3, k4 = jax.random.split(key, 4)

    # Large enough (>= ~256 KiB/array) to take the Pallas streaming path.
    x = jax.random.normal(k1, (2, 8, 64, 128), dtype=jnp.float32)   # 512 KiB
    y = jax.random.normal(k2, (2, 8, 64, 128), dtype=jnp.float32)
    # Ragged flat length (not a multiple of 128): bulk via Pallas, tail direct.
    z = jax.random.normal(k3, (3, 5, 67, 131), dtype=jnp.float32)
    # Small NCHW tensor (module's typical usage): direct-XLA fallback path.
    s = jax.random.normal(k4, (2, 4, 16, 16), dtype=jnp.float32)

    # single-input expression, explicit elementwise opt-in
    expr1 = Expression(safe_log_of_square, elementwise=True)
    out1 = jax.block_until_ready(expr1(x))
    ref1 = safe_log_of_square(x)

    # variadic (two-input) expression, elementwise-ness via the value probe
    expr2 = Expression(scaled_residual_add)
    out2 = jax.block_until_ready(expr2(x, y))
    ref2 = scaled_residual_add(x, y)

    # ragged-shape single-input expression (bulk Pallas + tiny tail)
    expr3 = Expression(square)
    out3 = jax.block_until_ready(expr3(z))
    ref3 = square(z)

    # small tensor -> small-tensor fallback (plain expression_fn)
    expr4 = Expression(square)
    out4 = jax.block_until_ready(expr4(s))
    ref4 = square(s)

    assert out1.shape == x.shape and out1.dtype == ref1.dtype
    assert out2.shape == x.shape and out2.dtype == ref2.dtype
    assert out3.shape == z.shape and out3.dtype == ref3.dtype
    assert out4.shape == s.shape and out4.dtype == ref4.dtype
    assert jnp.allclose(out1, ref1, atol=1e-5, rtol=1e-5)
    assert jnp.allclose(out2, ref2, atol=1e-5, rtol=1e-5)
    assert jnp.allclose(out3, ref3, atol=1e-5, rtol=1e-5)
    assert jnp.allclose(out4, ref4, atol=1e-5, rtol=1e-5)

    print("KERNEL_OK")
</pallas_src>

<mosaic_0001>
module attributes {stable_mosaic.version = 11 : i64} {
  func.func @kernel(%arg0: i32, %arg1: memref<1024x128xf32, #tpu.memory_space<vmem>>, %arg2: memref<1024x128xf32, #tpu.memory_space<vmem>>) attributes {dimension_semantics = [#tpu.dimension_semantics<parallel>], iteration_bounds = array<i64: 1>, scalar_prefetch = 0 : i64, scratch_operands = 0 : i64, tpu.core_type = #tpu.core_type<tc>, window_params = [{transform_indices = @transform_0, window_bounds = array<i64: 1024, 128>}, {transform_indices = @transform_1, window_bounds = array<i64: 1024, 128>}]} {
    %c0 = arith.constant 0 : index
    %c0_0 = arith.constant 0 : index
    %0 = vector.load %arg1[%c0, %c0_0] : memref<1024x128xf32, #tpu.memory_space<vmem>>, vector<1024x128xf32>
    %1 = arith.mulf %0, %0 : vector<1024x128xf32>
    %cst = arith.constant 9.99999997E-7 : f32
    %2 = vector.broadcast %cst : f32 to vector<1024x128xf32>
    %3 = arith.maximumf %1, %2 : vector<1024x128xf32>
    %4 = math.log %3 : vector<1024x128xf32>
    %c0_1 = arith.constant 0 : index
    %c0_2 = arith.constant 0 : index
    %5 = vector.load %arg2[%c0_1, %c0_2] : memref<1024x128xf32, #tpu.memory_space<vmem>>, vector<1024x128xf32>
    tpu.vector_store %arg2[%c0_1, %c0_2], %4 {strides = array<i32>} : memref<1024x128xf32, #tpu.memory_space<vmem>>, vector<1024x128xf32>,
    return
  }
  func.func @transform_0(%arg0: i32) -> (i32, i32) {
    %c0_i32 = arith.constant 0 : i32
    %c0_i32_0 = arith.constant 0 : i32
    return %arg0, %c0_i32 : i32, i32
  }
  func.func @transform_1(%arg0: i32) -> (i32, i32) {
    %c0_i32 = arith.constant 0 : i32
    %c0_i32_0 = arith.constant 0 : i32
    return %arg0, %c0_i32 : i32, i32
  }
}

</mosaic_0001>

<bundles_post_ra>
// kernel: tpu_custom_call.1
= control target key start
LH: loop header
LB: loop body
LE: loop exit
PB: predicated region body
PF: predicated region fallthrough
CT: control target
= control target key end

     0   :  { %6 = vsyncpa [#allocation3], 0  ;;  %s1138_s0 = inlined_call_operand.hbm [shape: f32[1024,128], index: 0, kind: input, shape index: {}]   ;;  %s1139_s1 = inlined_call_operand.hbm [shape: f32[1024,128], index: 1, kind: output, shape index: {}]  }
   0x1   :  { %7 = vsyncpa [#allocation4], 0  ;;  %s1112_s6 = smov [#allocation2]  }
   0x2   :  { %s13_s7 = sshll.u32 %s1112_s6, 4  ;;  %s14_s7 = int_to_ptr.vmem [resolvable:$true] %s13_s7 }
   0x3   :  { %s1076_s8 = scalar_lea.vmem %s14_s7, 16384  ;;  %p1081_p1 = scmp.lt.s32.totalorder %s14_s7, %s14_s7 }
   0x4   :  { %p1077_p0 = scmp.ne.s32.totalorder %s14_s7, %s1076_s8  ;;  %p1082_p2 = scmp.lt.s32.totalorder %s1076_s8, %s1076_s8 }
   0x6   :  { %p1083_p3 = por %p1082_p2, %p1081_p1 }
   0x8   :  { %p1084_p4 = pnand %p1083_p3, %p1077_p0 }
   0xa   :  { %1087 = shalt.err (!%p1084_p4)
}
   0xb   :  { %s1113_s9 = smov 128   ;;  %s1114_s10 = smov 8  }
   0xc   :  { %19 = dma.hbm_to_vmem [thread:$0]  %s1138_s0, 16384, %s14_s7, [#allocation3], %s1113_s9, %s1113_s9, %s1114_s10  }
   0xd   :  { %1108 = dma.done.wait [#allocation3], 16384  }
   0xe   :  { %1109 = vsyncadd [#allocation3], 4294950912  ;;  %v23_v0 = vld [vmem:[#allocation2] sm:$0xff]  ;;  %v24_v1 = vld [vmem:[#allocation2 + $0x8] sm:$0xff]  ;;  %s1115_s0 = smov [#allocation5]  }
   0xf   :  { %v25_v2 = vld [vmem:[#allocation2 + $0x10] sm:$0xff]  ;;  %v151_v3 = vmul.f32 %v23_v0, %v23_v0  ;;  %v152_v4 = vmul.f32 %v24_v1, %v24_v1  ;;  %v26_v6 = vld [vmem:[#allocation2 + $0x18] sm:$0xff]  ;;  %v27_v7 = vld [vmem:[#allocation2 + $0x20] sm:$0xff]  ;;  %s796_s13 = sshll.u32 %s1115_s0, 4  ;;  %s797_s13 = int_to_ptr.vmem [resolvable:$true] %s796_s13 }
  0x10   :  { %v153_v5 = vmul.f32 %v25_v2, %v25_v2  ;;  %v28_v8 = vld [vmem:[#allocation2 + $0x28] sm:$0xff]  ;;  %v154_v9 = vmul.f32 %v26_v6, %v26_v6  ;;  %v155_v10 = vmul.f32 %v27_v7, %v27_v7  ;;  %v29_v12 = vld [vmem:[#allocation2 + $0x30] sm:$0xff]  ;;  %v30_v13 = vld [vmem:[#allocation2 + $0x38] sm:$0xff]  ;;  %s1088_s14 = scalar_lea.vmem %s797_s13, 16384  ;;  %p1093_p6 = scmp.lt.s32.totalorder %s797_s13, %s797_s13 }
  0x11   :  { %v156_v11 = vmul.f32 %v28_v8, %v28_v8  ;;  %v31_v14 = vld [vmem:[#allocation2 + $0x40] sm:$0xff]  ;;  %v279_v15 = vmax.f32 %v151_v3, 1e-06  ;;  %v280_v16 = vmax.f32 %v152_v4, 1e-06  ;;  %v157_v18 = vmul.f32 %v29_v12, %v29_v12  ;;  %v32_v23 = vld [vmem:[#allocation2 + $0x48] sm:$0xff]  ;;  %p1089_p5 = scmp.ne.s32.totalorder %s797_s13, %s1088_s14  ;;  %p1094_p7 = scmp.lt.s32.totalorder %s1088_s14, %s1088_s14 }
  0x12   :  { %v281_v17 = vmax.f32 %v153_v5, 1e-06  ;;  %v282_v19 = vmax.f32 %v154_v9, 1e-06  ;;  %v158_v20 = vmul.f32 %v30_v13, %v30_v13  ;;  %v283_v21 = vmax.f32 %v155_v10, 1e-06 }
  0x13   :  { %812 = vlog2.f32 %v279_v15  ;;  %v159_v22 = vmul.f32 %v31_v14, %v31_v14  ;;  %v33_v24 = vld [vmem:[#allocation2 + $0x50] sm:$0xff]  ;;  %v34_v25 = vld [vmem:[#allocation2 + $0x58] sm:$0xff]  ;;  %v284_v26 = vmax.f32 %v156_v11, 1e-06  ;;  %v160_v27 = vmul.f32 %v32_v23, %v32_v23  ;;  %v35_v28 = vld [vmem:[#allocation2 + $0x60] sm:$0xff]  ;;  %p1095_p8 = por %p1094_p7, %p1093_p6 }
  0x14   :  { %814 = vlog2.f32 %v280_v16  ;;  %v285_v29 = vmax.f32 %v157_v18, 1e-06  ;;  %v161_v30 = vmul.f32 %v33_v24, %v33_v24  ;;  %v36_v31 = vld [vmem:[#allocation2 + $0x68] sm:$0xff]  ;;  %v286_v32 = vmax.f32 %v158_v20, 1e-06  ;;  %v37_v34 = vld [vmem:[#allocation2 + $0x70] sm:$0xff] }
  0x15   :  { %816 = vlog2.f32 %v281_v17  ;;  %v162_v33 = vmul.f32 %v34_v25, %v34_v25  ;;  %v287_v35 = vmax.f32 %v159_v22, 1e-06  ;;  %v163_v36 = vmul.f32 %v35_v28, %v35_v28  ;;  %v38_v37 = vld [vmem:[#allocation2 + $0x78] sm:$0xff]  ;;  %v39_v40 = vld [vmem:[#allocation2 + $0x80] sm:$0xff]  ;;  %v40_v43 = vld [vmem:[#allocation2 + $0x88] sm:$0xff]  ;;  %p1096_p9 = pnand %p1095_p8, %p1089_p5 }
  0x16   :  { %818 = vlog2.f32 %v282_v19  ;;  %v288_v38 = vmax.f32 %v160_v27, 1e-06  ;;  %v164_v39 = vmul.f32 %v36_v31, %v36_v31  ;;  %v289_v41 = vmax.f32 %v161_v30, 1e-06  ;;  %v41_v46 = vld [vmem:[#allocation2 + $0x90] sm:$0xff]  ;;  %v42_v49 = vld [vmem:[#allocation2 + $0x98] sm:$0xff] }
  0x17   :  { %820 = vlog2.f32 %v283_v21  ;;  %v165_v42 = vmul.f32 %v37_v34, %v37_v34  ;;  %v290_v44 = vmax.f32 %v162_v33, 1e-06  ;;  %v166_v45 = vmul.f32 %v38_v37, %v38_v37  ;;  %v43_v52 = vld [vmem:[#allocation2 + $0xa0] sm:$0xff]  ;;  %v44_v55 = vld [vmem:[#allocation2 + $0xa8] sm:$0xff]  ;;  %v45_v58 = vld [vmem:[#allocation2 + $0xb0] sm:$0xff] }
  0x18   :  { %822 = vlog2.f32 %v284_v26  ;;  %v291_v47 = vmax.f32 %v163_v36, 1e-06  ;;  %v167_v48 = vmul.f32 %v39_v40, %v39_v40  ;;  %v292_v50 = vmax.f32 %v164_v39, 1e-06  ;;  %v46_v61 = vld [vmem:[#allocation2 + $0xb8] sm:$0xff]  ;;  %v47_v1 = vld [vmem:[#allocation2 + $0xc0] sm:$0xff] }
  0x19   :  { %824 = vlog2.f32 %v285_v29  ;;  %v168_v51 = vmul.f32 %v40_v43, %v40_v43  ;;  %v293_v53 = vmax.f32 %v165_v42, 1e-06  ;;  %v169_v54 = vmul.f32 %v41_v46, %v41_v46  ;;  %v48_v6 = vld [vmem:[#allocation2 + $0xc8] sm:$0xff]  ;;  %v49_v11 = vld [vmem:[#allocation2 + $0xd0] sm:$0xff]  ;;  %v50_v16 = vld [vmem:[#allocation2 + $0xd8] sm:$0xff] }
  0x1a   :  { %826 = vlog2.f32 %v286_v32  ;;  %v294_v56 = vmax.f32 %v166_v45, 1e-06  ;;  %v170_v57 = vmul.f32 %v42_v49, %v42_v49  ;;  %v295_v59 = vmax.f32 %v167_v48, 1e-06  ;;  %v51_v21 = vld [vmem:[#allocation2 + $0xe0] sm:$0xff]  ;;  %v52_v26 = vld [vmem:[#allocation2 + $0xe8] sm:$0xff] }
  0x1b   :  { %828 = vlog2.f32 %v287_v35  ;;  %v171_v60 = vmul.f32 %v43_v52, %v43_v52  ;;  %v296_v63 = vmax.f32 %v168_v51, 1e-06  ;;  %v172_v0 = vmul.f32 %v44_v55, %v44_v55  ;;  %v53_v31 = vld [vmem:[#allocation2 + $0xf0] sm:$0xff]  ;;  %v54_v36 = vld [vmem:[#allocation2 + $0xf8] sm:$0xff]  ;;  %v56_v46 = vld [vmem:[#allocation2 + $0x108] sm:$0xff] }
  0x1c   :  { %830 = vlog2.f32 %v288_v38  ;;  %v297_v4 = vmax.f32 %v169_v54, 1e-06  ;;  %v173_v5 = vmul.f32 %v45_v58, %v45_v58  ;;  %v298_v9 = vmax.f32 %v170_v57, 1e-06  ;;  %v57_v51 = vld [vmem:[#allocation2 + $0x110] sm:$0xff] }
  0x1d   :  { %832 = vlog2.f32 %v289_v41  ;;  %v174_v10 = vmul.f32 %v46_v61, %v46_v61  ;;  %v299_v14 = vmax.f32 %v171_v60, 1e-06  ;;  %v175_v15 = vmul.f32 %v47_v1, %v47_v1  ;;  %v55_v41 = vld [vmem:[#allocation2 + $0x100] sm:$0xff] }
  0x1e   :  { %834 = vlog2.f32 %v290_v44  ;;  %v300_v19 = vmax.f32 %v172_v0, 1e-06  ;;  %v176_v20 = vmul.f32 %v48_v6, %v48_v6  ;;  %v301_v24 = vmax.f32 %v173_v5, 1e-06  ;;  %v59_v61 = vld [vmem:[#allocation2 + $0x120] sm:$0xff] }
  0x1f   :  { %836 = vlog2.f32 %v291_v47  ;;  %v177_v25 = vmul.f32 %v49_v11, %v49_v11  ;;  %v302_v29 = vmax.f32 %v174_v10, 1e-06  ;;  %v178_v30 = vmul.f32 %v50_v16, %v50_v16 }
  0x20   :  { %v813_v62 = vpop.eup %812  ;;  %838 = vlog2.f32 %v292_v50  ;;  %v303_v34 = vmax.f32 %v175_v15, 1e-06  ;;  %v179_v35 = vmul.f32 %v51_v21, %v51_v21  ;;  %v304_v39 = vmax.f32 %v176_v20, 1e-06 }
  0x21   :  { %v815_v2 = vpop.eup %814  ;;  %v408_v3 = vmul.f32 0.6931472, %v813_v62  ;;  %840 = vlog2.f32 %v293_v53  ;;  %v180_v40 = vmul.f32 %v52_v26, %v52_v26  ;;  %v305_v44 = vmax.f32 %v177_v25, 1e-06 }
  0x22   :  { %v817_v7 = vpop.eup %816  ;;  %v410_v8 = vmul.f32 0.6931472, %v815_v2  ;;  %842 = vlog2.f32 %v294_v56  ;;  %v181_v45 = vmul.f32 %v53_v31, %v53_v31  ;;  %v306_v49 = vmax.f32 %v178_v30, 1e-06  ;;  %v58_v56 = vld [vmem:[#allocation2 + $0x118] sm:$0xff]  ;;  %v60_v2 = vld [vmem:[#allocation2 + $0x128] sm:$0xff] }
  0x23   :  { %v819_v12 = vpop.eup %818  ;;  %663 = vst [vmem:[#allocation5] sm:$0xff] %v408_v3  ;;  %v412_v13 = vmul.f32 0.6931472, %v817_v7  ;;  %844 = vlog2.f32 %v295_v59  ;;  %v182_v50 = vmul.f32 %v54_v36, %v54_v36  ;;  %v307_v54 = vmax.f32 %v179_v35, 1e-06  ;;  %v61_v7 = vld [vmem:[#allocation2 + $0x130] sm:$0xff] }
  0x24   :  { %v821_v17 = vpop.eup %820  ;;  %664 = vst [vmem:[#allocation5 + $0x8] sm:$0xff] %v410_v8  ;;  %v414_v18 = vmul.f32 0.6931472, %v819_v12  ;;  %846 = vlog2.f32 %v296_v63  ;;  %v183_v55 = vmul.f32 %v55_v41, %v55_v41  ;;  %v308_v59 = vmax.f32 %v180_v40, 1e-06  ;;  %v62_v12 = vld [vmem:[#allocation2 + $0x138] sm:$0xff] }
  0x25   :  { %v823_v22 = vpop.eup %822  ;;  %665 = vst [vmem:[#allocation5 + $0x10] sm:$0xff] %v412_v13  ;;  %v416_v23 = vmul.f32 0.6931472, %v821_v17  ;;  %848 = vlog2.f32 %v297_v4  ;;  %v184_v60 = vmul.f32 %v56_v46, %v56_v46  ;;  %v309_v0 = vmax.f32 %v181_v45, 1e-06  ;;  %v63_v17 = vld [vmem:[#allocation2 + $0x140] sm:$0xff] }
  0x26   :  { %v825_v27 = vpop.eup %824  ;;  %666 = vst [vmem:[#allocation5 + $0x18] sm:$0xff] %v414_v18  ;;  %v418_v28 = vmul.f32 0.6931472, %v823_v22  ;;  %850 = vlog2.f32 %v298_v9  ;;  %v185_v1 = vmul.f32 %v57_v51, %v57_v51  ;;  %v310_v5 = vmax.f32 %v182_v50, 1e-06  ;;  %v64_v22 = vld [vmem:[#allocation2 + $0x148] sm:$0xff] }
  0x27   :  { %v827_v32 = vpop.eup %826  ;;  %667 = vst [vmem:[#allocation5 + $0x20] sm:$0xff] %v416_v23  ;;  %v420_v33 = vmul.f32 0.6931472, %v825_v27  ;;  %852 = vlog2.f32 %v299_v14  ;;  %v186_v6 = vmul.f32 %v58_v56, %v58_v56  ;;  %v311_v10 = vmax.f32 %v183_v55, 1e-06  ;;  %v65_v27 = vld [vmem:[#allocation2 + $0x150] sm:$0xff] }
  0x28   :  { %v829_v37 = vpop.eup %828  ;;  %668 = vst [vmem:[#allocation5 + $0x28] sm:$0xff] %v418_v28  ;;  %v422_v38 = vmul.f32 0.6931472, %v827_v32  ;;  %854 = vlog2.f32 %v300_v19  ;;  %v187_v11 = vmul.f32 %v59_v61, %v59_v61  ;;  %v312_v15 = vmax.f32 %v184_v60, 1e-06  ;;  %v66_v32 = vld [vmem:[#allocation2 + $0x158] sm:$0xff] }
  0x29   :  { %v831_v42 = vpop.eup %830  ;;  %669 = vst [vmem:[#allocation5 + $0x30] sm:$0xff] %v420_v33  ;;  %v424_v43 = vmul.f32 0.6931472, %v829_v37  ;;  %856 = vlog2.f32 %v301_v24  ;;  %v188_v16 = vmul.f32 %v60_v2, %v60_v2  ;;  %v313_v20 = vmax.f32 %v185_v1, 1e-06  ;;  %v67_v37 = vld [vmem:[#allocation2 + $0x160] sm:$0xff] }
  0x2a   :  { %v833_v47 = vpop.eup %832  ;;  %670 = vst [vmem:[#allocation5 + $0x38] sm:$0xff] %v422_v38  ;;  %v426_v48 = vmul.f32 0.6931472, %v831_v42  ;;  %858 = vlog2.f32 %v302_v29  ;;  %v189_v21 = vmul.f32 %v61_v7, %v61_v7  ;;  %v314_v25 = vmax.f32 %v186_v6, 1e-06  ;;  %v68_v42 = vld [vmem:[#allocation2 + $0x168] sm:$0xff] }
  0x2b   :  { %v835_v52 = vpop.eup %834  ;;  %671 = vst [vmem:[#allocation5 + $0x40] sm:$0xff] %v424_v43  ;;  %v428_v53 = vmul.f32 0.6931472, %v833_v47  ;;  %860 = vlog2.f32 %v303_v34  ;;  %v190_v26 = vmul.f32 %v62_v12, %v62_v12  ;;  %v315_v30 = vmax.f32 %v187_v11, 1e-06  ;;  %v69_v47 = vld [vmem:[#allocation2 + $0x170] sm:$0xff] }
  0x2c   :  { %v837_v57 = vpop.eup %836  ;;  %672 = vst [vmem:[#allocation5 + $0x48] sm:$0xff] %v426_v48  ;;  %v430_v58 = vmul.f32 0.6931472, %v835_v52  ;;  %862 = vlog2.f32 %v304_v39  ;;  %v191_v31 = vmul.f32 %v63_v17, %v63_v17  ;;  %v316_v35 = vmax.f32 %v188_v16, 1e-06  ;;  %v70_v52 = vld [vmem:[#allocation2 + $0x178] sm:$0xff] }
  0x2d   :  { %v839_v62 = vpop.eup %838  ;;  %673 = vst [vmem:[#allocation5 + $0x50] sm:$0xff] %v428_v53  ;;  %v432_v63 = vmul.f32 0.6931472, %v837_v57  ;;  %864 = vlog2.f32 %v305_v44  ;;  %v192_v36 = vmul.f32 %v64_v22, %v64_v22  ;;  %v317_v40 = vmax.f32 %v189_v21, 1e-06  ;;  %v71_v57 = vld [vmem:[#allocation2 + $0x180] sm:$0xff] }
  0x2e   :  { %v841_v3 = vpop.eup %840  ;;  %674 = vst [vmem:[#allocation5 + $0x58] sm:$0xff] %v430_v58  ;;  %v434_v4 = vmul.f32 0.6931472, %v839_v62  ;;  %866 = vlog2.f32 %v306_v49  ;;  %v193_v41 = vmul.f32 %v65_v27, %v65_v27  ;;  %v318_v45 = vmax.f32 %v190_v26, 1e-06  ;;  %v72_v62 = vld [vmem:[#allocation2 + $0x188] sm:$0xff] }
  0x2f   :  { %v843_v8 = vpop.eup %842  ;;  %675 = vst [vmem:[#allocation5 + $0x60] sm:$0xff] %v432_v63  ;;  %v436_v9 = vmul.f32 0.6931472, %v841_v3  ;;  %868 = vlog2.f32 %v307_v54  ;;  %v194_v46 = vmul.f32 %v66_v32, %v66_v32  ;;  %v319_v50 = vmax.f32 %v191_v31, 1e-06  ;;  %v73_v3 = vld [vmem:[#allocation2 + $0x190] sm:$0xff] }
  0x30   :  { %v845_v13 = vpop.eup %844  ;;  %676 = vst [vmem:[#allocation5 + $0x68] sm:$0xff] %v434_v4  ;;  %v438_v14 = vmul.f32 0.6931472, %v843_v8  ;;  %870 = vlog2.f32 %v308_v59  ;;  %v195_v51 = vmul.f32 %v67_v37, %v67_v37  ;;  %v320_v55 = vmax.f32 %v192_v36, 1e-06  ;;  %v74_v8 = vld [vmem:[#allocation2 + $0x198] sm:$0xff] }
  0x31   :  { %v847_v18 = vpop.eup %846  ;;  %677 = vst [vmem:[#allocation5 + $0x70] sm:$0xff] %v436_v9  ;;  %v440_v19 = vmul.f32 0.6931472, %v845_v13  ;;  %872 = vlog2.f32 %v309_v0  ;;  %v196_v56 = vmul.f32 %v68_v42, %v68_v42  ;;  %v321_v60 = vmax.f32 %v193_v41, 1e-06  ;;  %v75_v13 = vld [vmem:[#allocation2 + $0x1a0] sm:$0xff] }
  0x32   :  { %v849_v23 = vpop.eup %848  ;;  %678 = vst [vmem:[#allocation5 + $0x78] sm:$0xff] %v438_v14  ;;  %v442_v24 = vmul.f32 0.6931472, %v847_v18  ;;  %874 = vlog2.f32 %v310_v5  ;;  %v197_v61 = vmul.f32 %v69_v47, %v69_v47  ;;  %v322_v1 = vmax.f32 %v194_v46, 1e-06  ;;  %v76_v18 = vld [vmem:[#allocation2 + $0x1a8] sm:$0xff] }
  0x33   :  { %v851_v28 = vpop.eup %850  ;;  %679 = vst [vmem:[#allocation5 + $0x80] sm:$0xff] %v440_v19  ;;  %v444_v29 = vmul.f32 0.6931472, %v849_v23  ;;  %876 = vlog2.f32 %v311_v10  ;;  %v198_v2 = vmul.f32 %v70_v52, %v70_v52  ;;  %v323_v6 = vmax.f32 %v195_v51, 1e-06  ;;  %v77_v23 = vld [vmem:[#allocation2 + $0x1b0] sm:$0xff] }
  0x34   :  { %v853_v33 = vpop.eup %852  ;;  %680 = vst [vmem:[#allocation5 + $0x88] sm:$0xff] %v442_v24  ;;  %v446_v34 = vmul.f32 0.6931472, %v851_v28  ;;  %878 = vlog2.f32 %v312_v15  ;;  %v199_v7 = vmul.f32 %v71_v57, %v71_v57  ;;  %v324_v11 = vmax.f32 %v196_v56, 1e-06  ;;  %v78_v28 = vld [vmem:[#allocation2 + $0x1b8] sm:$0xff] }
  0x35   :  { %v855_v38 = vpop.eup %854  ;;  %681 = vst [vmem:[#allocation5 + $0x90] sm:$0xff] %v444_v29  ;;  %v448_v39 = vmul.f32 0.6931472, %v853_v33  ;;  %880 = vlog2.f32 %v313_v20  ;;  %v200_v12 = vmul.f32 %v72_v62, %v72_v62  ;;  %v325_v16 = vmax.f32 %v197_v61, 1e-06  ;;  %v79_v33 = vld [vmem:[#allocation2 + $0x1c0] sm:$0xff] }
  0x36   :  { %v857_v43 = vpop.eup %856  ;;  %682 = vst [vmem:[#allocation5 + $0x98] sm:$0xff] %v446_v34  ;;  %v450_v44 = vmul.f32 0.6931472, %v855_v38  ;;  %882 = vlog2.f32 %v314_v25  ;;  %v201_v17 = vmul.f32 %v73_v3, %v73_v3  ;;  %v326_v21 = vmax.f32 %v198_v2, 1e-06  ;;  %v80_v38 = vld [vmem:[#allocation2 + $0x1c8] sm:$0xff] }
  0x37   :  { %v859_v48 = vpop.eup %858  ;;  %683 = vst [vmem:[#allocation5 + $0xa0] sm:$0xff] %v448_v39  ;;  %v452_v49 = vmul.f32 0.6931472, %v857_v43  ;;  %884 = vlog2.f32 %v315_v30  ;;  %v202_v22 = vmul.f32 %v74_v8, %v74_v8  ;;  %v327_v26 = vmax.f32 %v199_v7, 1e-06  ;;  %v81_v43 = vld [vmem:[#allocation2 + $0x1d0] sm:$0xff] }
  0x38   :  { %v861_v53 = vpop.eup %860  ;;  %684 = vst [vmem:[#allocation5 + $0xa8] sm:$0xff] %v450_v44  ;;  %v454_v54 = vmul.f32 0.6931472, %v859_v48  ;;  %886 = vlog2.f32 %v316_v35  ;;  %v203_v27 = vmul.f32 %v75_v13, %v75_v13  ;;  %v328_v31 = vmax.f32 %v200_v12, 1e-06  ;;  %v82_v48 = vld [vmem:[#allocation2 + $0x1d8] sm:$0xff] }
  0x39   :  { %v863_v58 = vpop.eup %862  ;;  %685 = vst [vmem:[#allocation5 + $0xb0] sm:$0xff] %v452_v49  ;;  %v456_v59 = vmul.f32 0.6931472, %v861_v53  ;;  %888 = vlog2.f32 %v317_v40  ;;  %v204_v32 = vmul.f32 %v76_v18, %v76_v18  ;;  %v329_v36 = vmax.f32 %v201_v17, 1e-06  ;;  %v83_v53 = vld [vmem:[#allocation2 + $0x1e0] sm:$0xff] }
  0x3a   :  { %v865_v63 = vpop.eup %864  ;;  %686 = vst [vmem:[#allocation5 + $0xb8] sm:$0xff] %v454_v54  ;;  %v458_v0 = vmul.f32 0.6931472, %v863_v58  ;;  %890 = vlog2.f32 %v318_v45  ;;  %v205_v37 = vmul.f32 %v77_v23, %v77_v23  ;;  %v330_v41 = vmax.f32 %v202_v22, 1e-06  ;;  %v84_v58 = vld [vmem:[#allocation2 + $0x1e8] sm:$0xff] }
  0x3b   :  { %v867_v4 = vpop.eup %866  ;;  %687 = vst [vmem:[#allocation5 + $0xc0] sm:$0xff] %v456_v59  ;;  %v460_v5 = vmul.f32 0.6931472, %v865_v63  ;;  %892 = vlog2.f32 %v319_v50  ;;  %v206_v42 = vmul.f32 %v78_v28, %v78_v28  ;;  %v331_v46 = vmax.f32 %v203_v27, 1e-06  ;;  %v85_v63 = vld [vmem:[#allocation2 + $0x1f0] sm:$0xff] }
  0x3c   :  { %v869_v9 = vpop.eup %868  ;;  %688 = vst [vmem:[#allocation5 + $0xc8] sm:$0xff] %v458_v0  ;;  %v462_v10 = vmul.f32 0.6931472, %v867_v4  ;;  %894 = vlog2.f32 %v320_v55  ;;  %v207_v47 = vmul.f32 %v79_v33, %v79_v33  ;;  %v332_v51 = vmax.f32 %v204_v32, 1e-06  ;;  %v86_v4 = vld [vmem:[#allocation2 + $0x1f8] sm:$0xff] }
  0x3d   :  { %v871_v14 = vpop.eup %870  ;;  %689 = vst [vmem:[#allocation5 + $0xd0] sm:$0xff] %v460_v5  ;;  %v464_v15 = vmul.f32 0.6931472, %v869_v9  ;;  %896 = vlog2.f32 %v321_v60  ;;  %v208_v52 = vmul.f32 %v80_v38, %v80_v38  ;;  %v333_v56 = vmax.f32 %v205_v37, 1e-06  ;;  %v87_v9 = vld [vmem:[#allocation2 + $0x200] sm:$0xff] }
  0x3e   :  { %v873_v19 = vpop.eup %872  ;;  %690 = vst [vmem:[#allocation5 + $0xd8] sm:$0xff] %v462_v10  ;;  %v466_v20 = vmul.f32 0.6931472, %v871_v14  ;;  %898 = vlog2.f32 %v322_v1  ;;  %v209_v57 = vmul.f32 %v81_v43, %v81_v43  ;;  %v334_v61 = vmax.f32 %v206_v42, 1e-06  ;;  %v88_v14 = vld [vmem:[#allocation2 + $0x208] sm:$0xff] }
  0x3f   :  { %v875_v24 = vpop.eup %874  ;;  %691 = vst [vmem:[#allocation5 + $0xe0] sm:$0xff] %v464_v15  ;;  %v468_v25 = vmul.f32 0.6931472, %v873_v19  ;;  %900 = vlog2.f32 %v323_v6  ;;  %v210_v62 = vmul.f32 %v82_v48, %v82_v48  ;;  %v335_v2 = vmax.f32 %v207_v47, 1e-06  ;;  %v89_v19 = vld [vmem:[#allocation2 + $0x210] sm:$0xff] }
  0x40   :  { %v877_v29 = vpop.eup %876  ;;  %692 = vst [vmem:[#allocation5 + $0xe8] sm:$0xff] %v466_v20  ;;  %v470_v30 = vmul.f32 0.6931472, %v875_v24  ;;  %902 = vlog2.f32 %v324_v11  ;;  %v211_v3 = vmul.f32 %v83_v53, %v83_v53  ;;  %v336_v7 = vmax.f32 %v208_v52, 1e-06  ;;  %v90_v24 = vld [vmem:[#allocation2 + $0x218] sm:$0xff] }
  0x41   :  { %v879_v34 = vpop.eup %878  ;;  %693 = vst [vmem:[#allocation5 + $0xf0] sm:$0xff] %v468_v25  ;;  %v472_v35 = vmul.f32 0.6931472, %v877_v29  ;;  %904 = vlog2.f32 %v325_v16  ;;  %v212_v8 = vmul.f32 %v84_v58, %v84_v58  ;;  %v337_v12 = vmax.f32 %v209_v57, 1e-06  ;;  %v91_v29 = vld [vmem:[#allocation2 + $0x220] sm:$0xff] }
  0x42   :  { %v881_v39 = vpop.eup %880  ;;  %694 = vst [vmem:[#allocation5 + $0xf8] sm:$0xff] %v470_v30  ;;  %v474_v40 = vmul.f32 0.6931472, %v879_v34  ;;  %906 = vlog2.f32 %v326_v21  ;;  %v213_v13 = vmul.f32 %v85_v63, %v85_v63  ;;  %v338_v17 = vmax.f32 %v210_v62, 1e-06  ;;  %v92_v34 = vld [vmem:[#allocation2 + $0x228] sm:$0xff] }
  0x43   :  { %v883_v44 = vpop.eup %882  ;;  %695 = vst [vmem:[#allocation5 + $0x100] sm:$0xff] %v472_v35  ;;  %v476_v45 = vmul.f32 0.6931472, %v881_v39  ;;  %908 = vlog2.f32 %v327_v26  ;;  %v214_v18 = vmul.f32 %v86_v4, %v86_v4  ;;  %v339_v22 = vmax.f32 %v211_v3, 1e-06  ;;  %v93_v39 = vld [vmem:[#allocation2 + $0x230] sm:$0xff] }
  0x44   :  { %v885_v49 = vpop.eup %884  ;;  %696 = vst [vmem:[#allocation5 + $0x108] sm:$0xff] %v474_v40  ;;  %v478_v50 = vmul.f32 0.6931472, %v883_v44  ;;  %910 = vlog2.f32 %v328_v31  ;;  %v215_v23 = vmul.f32 %v87_v9, %v87_v9  ;;  %v340_v27 = vmax.f32 %v212_v8, 1e-06  ;;  %v94_v44 = vld [vmem:[#allocation2 + $0x238] sm:$0xff] }
  0x45   :  { %v887_v54 = vpop.eup %886  ;;  %697 = vst [vmem:[#allocation5 + $0x110] sm:$0xff] %v476_v45  ;;  %v480_v55 = vmul.f32 0.6931472, %v885_v49  ;;  %912 = vlog2.f32 %v329_v36  ;;  %v216_v28 = vmul.f32 %v88_v14, %v88_v14  ;;  %v341_v32 = vmax.f32 %v213_v13, 1e-06  ;;  %v95_v49 = vld [vmem:[#allocation2 + $0x240] sm:$0xff] }
  0x46   :  { %v889_v59 = vpop.eup %888  ;;  %698 = vst [vmem:[#allocation5 + $0x118] sm:$0xff] %v478_v50  ;;  %v482_v60 = vmul.f32 0.6931472, %v887_v54  ;;  %914 = vlog2.f32 %v330_v41  ;;  %v217_v33 = vmul.f32 %v89_v19, %v89_v19  ;;  %v342_v37 = vmax.f32 %v214_v18, 1e-06  ;;  %v96_v54 = vld [vmem:[#allocation2 + $0x248] sm:$0xff] }
  0x47   :  { %v891_v0 = vpop.eup %890  ;;  %699 = vst [vmem:[#allocation5 + $0x120] sm:$0xff] %v480_v55  ;;  %v484_v1 = vmul.f32 0.6931472, %v889_v59  ;;  %916 = vlog2.f32 %v331_v46  ;;  %v218_v38 = vmul.f32 %v90_v24, %v90_v24  ;;  %v343_v42 = vmax.f32 %v215_v23, 1e-06  ;;  %v97_v59 = vld [vmem:[#allocation2 + $0x250] sm:$0xff] }
  0x48   :  { %v893_v5 = vpop.eup %892  ;;  %700 = vst [vmem:[#allocation5 + $0x128] sm:$0xff] %v482_v60  ;;  %v486_v6 = vmul.f32 0.6931472, %v891_v0  ;;  %918 = vlog2.f32 %v332_v51  ;;  %v219_v43 = vmul.f32 %v91_v29, %v91_v29  ;;  %v344_v47 = vmax.f32 %v216_v28, 1e-06  ;;  %v98_v0 = vld [vmem:[#allocation2 + $0x258] sm:$0xff] }
  0x49   :  { %v895_v10 = vpop.eup %894  ;;  %701 = vst [vmem:[#allocation5 + $0x130] sm:$0xff] %v484_v1  ;;  %v488_v11 = vmul.f32 0.6931472, %v893_v5  ;;  %920 = vlog2.f32 %v333_v56  ;;  %v220_v48 = vmul.f32 %v92_v34, %v92_v34  ;;  %v345_v52 = vmax.f32 %v217_v33, 1e-06  ;;  %v99_v5 = vld [vmem:[#allocation2 + $0x260] sm:$0xff] }
  0x4a   :  { %v897_v15 = vpop.eup %896  ;;  %702 = vst [vmem:[#allocation5 + $0x138] sm:$0xff] %v486_v6  ;;  %v490_v16 = vmul.f32 0.6931472, %v895_v10  ;;  %922 = vlog2.f32 %v334_v61  ;;  %v221_v53 = vmul.f32 %v93_v39, %v93_v39  ;;  %v346_v57 = vmax.f32 %v218_v38, 1e-06  ;;  %v100_v10 = vld [vmem:[#allocation2 + $0x268] sm:$0xff] }
  0x4b   :  { %v899_v20 = vpop.eup %898  ;;  %703 = vst [vmem:[#allocation5 + $0x140] sm:$0xff] %v488_v11  ;;  %v492_v21 = vmul.f32 0.6931472, %v897_v15  ;;  %924 = vlog2.f32 %v335_v2  ;;  %v222_v58 = vmul.f32 %v94_v44, %v94_v44  ;;  %v347_v62 = vmax.f32 %v219_v43, 1e-06  ;;  %v101_v15 = vld [vmem:[#allocation2 + $0x270] sm:$0xff] }
  0x4c   :  { %v901_v25 = vpop.eup %900  ;;  %704 = vst [vmem:[#allocation5 + $0x148] sm:$0xff] %v490_v16  ;;  %v494_v26 = vmul.f32 0.6931472, %v899_v20  ;;  %926 = vlog2.f32 %v336_v7  ;;  %v223_v63 = vmul.f32 %v95_v49, %v95_v49  ;;  %v348_v3 = vmax.f32 %v220_v48, 1e-06  ;;  %v102_v20 = vld [vmem:[#allocation2 + $0x278] sm:$0xff] }
  0x4d   :  { %v903_v30 = vpop.eup %902  ;;  %705 = vst [vmem:[#allocation5 + $0x150] sm:$0xff] %v492_v21  ;;  %v496_v31 = vmul.f32 0.6931472, %v901_v25  ;;  %928 = vlog2.f32 %v337_v12  ;;  %v224_v4 = vmul.f32 %v96_v54, %v96_v54  ;;  %v349_v8 = vmax.f32 %v221_v53, 1e-06  ;;  %v103_v25 = vld [vmem:[#allocation2 + $0x280] sm:$0xff] }
  0x4e   :  { %v905_v35 = vpop.eup %904  ;;  %706 = vst [vmem:[#allocation5 + $0x158] sm:$0xff] %v494_v26  ;;  %v498_v36 = vmul.f32 0.6931472, %v903_v30  ;;  %930 = vlog2.f32 %v338_v17  ;;  %v225_v9 = vmul.f32 %v97_v59, %v97_v59  ;;  %v350_v13 = vmax.f32 %v222_v58, 1e-06  ;;  %v104_v30 = vld [vmem:[#allocation2 + $0x288] sm:$0xff] }
  0x4f   :  { %v907_v40 = vpop.eup %906  ;;  %707 = vst [vmem:[#allocation5 + $0x160] sm:$0xff] %v496_v31  ;;  %v500_v41 = vmul.f32 0.6931472, %v905_v35  ;;  %932 = vlog2.f32 %v339_v22  ;;  %v226_v14 = vmul.f32 %v98_v0, %v98_v0  ;;  %v351_v18 = vmax.f32 %v223_v63, 1e-06  ;;  %v105_v35 = vld [vmem:[#allocation2 + $0x290] sm:$0xff] }
  0x50   :  { %v909_v45 = vpop.eup %908  ;;  %708 = vst [vmem:[#allocation5 + $0x168] sm:$0xff] %v498_v36  ;;  %v502_v46 = vmul.f32 0.6931472, %v907_v40  ;;  %934 = vlog2.f32 %v340_v27  ;;  %v227_v19 = vmul.f32 %v99_v5, %v99_v5  ;;  %v352_v23 = vmax.f32 %v224_v4, 1e-06  ;;  %v106_v40 = vld [vmem:[#allocation2 + $0x298] sm:$0xff] }
  0x51   :  { %v911_v50 = vpop.eup %910  ;;  %709 = vst [vmem:[#allocation5 + $0x170] sm:$0xff] %v500_v41  ;;  %v504_v51 = vmul.f32 0.6931472, %v909_v45  ;;  %936 = vlog2.f32 %v341_v32  ;;  %v228_v24 = vmul.f32 %v100_v10, %v100_v10  ;;  %v353_v28 = vmax.f32 %v225_v9, 1e-06  ;;  %v107_v45 = vld [vmem:[#allocation2 + $0x2a0] sm:$0xff] }
  0x52   :  { %v913_v55 = vpop.eup %912  ;;  %710 = vst [vmem:[#allocation5 + $0x178] sm:$0xff] %v502_v46  ;;  %v506_v56 = vmul.f32 0.6931472, %v911_v50  ;;  %938 = vlog2.f32 %v342_v37  ;;  %v229_v29 = vmul.f32 %v101_v15, %v101_v15  ;;  %v354_v33 = vmax.f32 %v226_v14, 1e-06  ;;  %v108_v50 = vld [vmem:[#allocation2 + $0x2a8] sm:$0xff] }
  0x53   :  { %v915_v60 = vpop.eup %914  ;;  %711 = vst [vmem:[#allocation5 + $0x180] sm:$0xff] %v504_v51  ;;  %v508_v61 = vmul.f32 0.6931472, %v913_v55  ;;  %940 = vlog2.f32 %v343_v42  ;;  %v230_v34 = vmul.f32 %v102_v20, %v102_v20  ;;  %v355_v38 = vmax.f32 %v227_v19, 1e-06  ;;  %v109_v55 = vld [vmem:[#allocation2 + $0x2b0] sm:$0xff] }
  0x54   :  { %v917_v1 = vpop.eup %916  ;;  %712 = vst [vmem:[#allocation5 + $0x188] sm:$0xff] %v506_v56  ;;  %v510_v2 = vmul.f32 0.6931472, %v915_v60  ;;  %942 = vlog2.f32 %v344_v47  ;;  %v231_v39 = vmul.f32 %v103_v25, %v103_v25  ;;  %v356_v43 = vmax.f32 %v228_v24, 1e-06  ;;  %v110_v60 = vld [vmem:[#allocation2 + $0x2b8] sm:$0xff] }
  0x55   :  { %v919_v6 = vpop.eup %918  ;;  %713 = vst [vmem:[#allocation5 + $0x190] sm:$0xff] %v508_v61  ;;  %v512_v7 = vmul.f32 0.6931472, %v917_v1  ;;  %944 = vlog2.f32 %v345_v52  ;;  %v232_v44 = vmul.f32 %v104_v30, %v104_v30  ;;  %v357_v48 = vmax.f32 %v229_v29, 1e-06  ;;  %v111_v1 = vld [vmem:[#allocation2 + $0x2c0] sm:$0xff] }
  0x56   :  { %v921_v11 = vpop.eup %920  ;;  %714 = vst [vmem:[#allocation5 + $0x198] sm:$0xff] %v510_v2  ;;  %v514_v12 = vmul.f32 0.6931472, %v919_v6  ;;  %946 = vlog2.f32 %v346_v57  ;;  %v233_v49 = vmul.f32 %v105_v35, %v105_v35  ;;  %v358_v53 = vmax.f32 %v230_v34, 1e-06  ;;  %v112_v6 = vld [vmem:[#allocation2 + $0x2c8] sm:$0xff] }
  0x57   :  { %v923_v16 = vpop.eup %922  ;;  %715 = vst [vmem:[#allocation5 + $0x1a0] sm:$0xff] %v512_v7  ;;  %v516_v17 = vmul.f32 0.6931472, %v921_v11  ;;  %948 = vlog2.f32 %v347_v62  ;;  %v234_v54 = vmul.f32 %v106_v40, %v106_v40  ;;  %v359_v58 = vmax.f32 %v231_v39, 1e-06  ;;  %v113_v11 = vld [vmem:[#allocation2 + $0x2d0] sm:$0xff] }
  0x58   :  { %v925_v21 = vpop.eup %924  ;;  %716 = vst [vmem:[#allocation5 + $0x1a8] sm:$0xff] %v514_v12  ;;  %v518_v22 = vmul.f32 0.6931472, %v923_v16  ;;  %950 = vlog2.f32 %v348_v3  ;;  %v235_v59 = vmul.f32 %v107_v45, %v107_v45  ;;  %v360_v63 = vmax.f32 %v232_v44, 1e-06  ;;  %v114_v16 = vld [vmem:[#allocation2 + $0x2d8] sm:$0xff] }
  0x59   :  { %v927_v26 = vpop.eup %926  ;;  %717 = vst [vmem:[#allocation5 + $0x1b0] sm:$0xff] %v516_v17  ;;  %v520_v27 = vmul.f32 0.6931472, %v925_v21  ;;  %952 = vlog2.f32 %v349_v8  ;;  %v236_v0 = vmul.f32 %v108_v50, %v108_v50  ;;  %v361_v4 = vmax.f32 %v233_v49, 1e-06  ;;  %v115_v21 = vld [vmem:[#allocation2 + $0x2e0] sm:$0xff] }
  0x5a   :  { %v929_v31 = vpop.eup %928  ;;  %718 = vst [vmem:[#allocation5 + $0x1b8] sm:$0xff] %v518_v22  ;;  %v522_v32 = vmul.f32 0.6931472, %v927_v26  ;;  %954 = vlog2.f32 %v350_v13  ;;  %v237_v5 = vmul.f32 %v109_v55, %v109_v55  ;;  %v362_v9 = vmax.f32 %v234_v54, 1e-06  ;;  %v116_v26 = vld [vmem:[#allocation2 + $0x2e8] sm:$0xff] }
  0x5b   :  { %v931_v36 = vpop.eup %930  ;;  %719 = vst [vmem:[#allocation5 + $0x1c0] sm:$0xff] %v520_v27  ;;  %v524_v37 = vmul.f32 0.6931472, %v929_v31  ;;  %956 = vlog2.f32 %v351_v18  ;;  %v238_v10 = vmul.f32 %v110_v60, %v110_v60  ;;  %v363_v14 = vmax.f32 %v235_v59, 1e-06  ;;  %v117_v31 = vld [vmem:[#allocation2 + $0x2f0] sm:$0xff] }
  0x5c   :  { %v933_v41 = vpop.eup %932  ;;  %720 = vst [vmem:[#allocation5 + $0x1c8] sm:$0xff] %v522_v32  ;;  %v526_v42 = vmul.f32 0.6931472, %v931_v36  ;;  %958 = vlog2.f32 %v352_v23  ;;  %v239_v15 = vmul.f32 %v111_v1, %v111_v1  ;;  %v364_v19 = vmax.f32 %v236_v0, 1e-06  ;;  %v118_v36 = vld [vmem:[#allocation2 + $0x2f8] sm:$0xff] }
  0x5d   :  { %v935_v46 = vpop.eup %934  ;;  %721 = vst [vmem:[#allocation5 + $0x1d0] sm:$0xff] %v524_v37  ;;  %v528_v47 = vmul.f32 0.6931472, %v933_v41  ;;  %960 = vlog2.f32 %v353_v28  ;;  %v240_v20 = vmul.f32 %v112_v6, %v112_v6  ;;  %v365_v24 = vmax.f32 %v237_v5, 1e-06  ;;  %v119_v41 = vld [vmem:[#allocation2 + $0x300] sm:$0xff] }
  0x5e   :  { %v937_v51 = vpop.eup %936  ;;  %722 = vst [vmem:[#allocation5 + $0x1d8] sm:$0xff] %v526_v42  ;;  %v530_v52 = vmul.f32 0.6931472, %v935_v46  ;;  %962 = vlog2.f32 %v354_v33  ;;  %v241_v25 = vmul.f32 %v113_v11, %v113_v11  ;;  %v366_v29 = vmax.f32 %v238_v10, 1e-06  ;;  %v120_v46 = vld [vmem:[#allocation2 + $0x308] sm:$0xff] }
  0x5f   :  { %v939_v56 = vpop.eup %938  ;;  %723 = vst [vmem:[#allocation5 + $0x1e0] sm:$0xff] %v528_v47  ;;  %v532_v57 = vmul.f32 0.6931472, %v937_v51  ;;  %964 = vlog2.f32 %v355_v38  ;;  %v242_v30 = vmul.f32 %v114_v16, %v114_v16  ;;  %v367_v34 = vmax.f32 %v239_v15, 1e-06  ;;  %v121_v51 = vld [vmem:[#allocation2 + $0x310] sm:$0xff] }
  0x60   :  { %v941_v61 = vpop.eup %940  ;;  %724 = vst [vmem:[#allocation5 + $0x1e8] sm:$0xff] %v530_v52  ;;  %v534_v62 = vmul.f32 0.6931472, %v939_v56  ;;  %966 = vlog2.f32 %v356_v43  ;;  %v243_v35 = vmul.f32 %v115_v21, %v115_v21  ;;  %v368_v39 = vmax.f32 %v240_v20, 1e-06  ;;  %v122_v56 = vld [vmem:[#allocation2 + $0x318] sm:$0xff] }
  0x61   :  { %v943_v2 = vpop.eup %942  ;;  %725 = vst [vmem:[#allocation5 + $0x1f0] sm:$0xff] %v532_v57  ;;  %v536_v3 = vmul.f32 0.6931472, %v941_v61  ;;  %968 = vlog2.f32 %v357_v48  ;;  %v244_v40 = vmul.f32 %v116_v26, %v116_v26  ;;  %v369_v44 = vmax.f32 %v241_v25, 1e-06  ;;  %v123_v61 = vld [vmem:[#allocation2 + $0x320] sm:$0xff] }
  0x62   :  { %v945_v7 = vpop.eup %944  ;;  %726 = vst [vmem:[#allocation5 + $0x1f8] sm:$0xff] %v534_v62  ;;  %v538_v8 = vmul.f32 0.6931472, %v943_v2  ;;  %970 = vlog2.f32 %v358_v53  ;;  %v245_v45 = vmul.f32 %v117_v31, %v117_v31  ;;  %v370_v49 = vmax.f32 %v242_v30, 1e-06  ;;  %v124_v2 = vld [vmem:[#allocation2 + $0x328] sm:$0xff] }
  0x63   :  { %v947_v12 = vpop.eup %946  ;;  %727 = vst [vmem:[#allocation5 + $0x200] sm:$0xff] %v536_v3  ;;  %v540_v13 = vmul.f32 0.6931472, %v945_v7  ;;  %972 = vlog2.f32 %v359_v58  ;;  %v246_v50 = vmul.f32 %v118_v36, %v118_v36  ;;  %v371_v54 = vmax.f32 %v243_v35, 1e-06  ;;  %v125_v7 = vld [vmem:[#allocation2 + $0x330] sm:$0xff] }
  0x64   :  { %v949_v17 = vpop.eup %948  ;;  %728 = vst [vmem:[#allocation5 + $0x208] sm:$0xff] %v538_v8  ;;  %v542_v18 = vmul.f32 0.6931472, %v947_v12  ;;  %974 = vlog2.f32 %v360_v63  ;;  %v247_v55 = vmul.f32 %v119_v41, %v119_v41  ;;  %v372_v59 = vmax.f32 %v244_v40, 1e-06  ;;  %v126_v12 = vld [vmem:[#allocation2 + $0x338] sm:$0xff] }
  0x65   :  { %v951_v22 = vpop.eup %950  ;;  %729 = vst [vmem:[#allocation5 + $0x210] sm:$0xff] %v540_v13  ;;  %v544_v23 = vmul.f32 0.6931472, %v949_v17  ;;  %976 = vlog2.f32 %v361_v4  ;;  %v248_v60 = vmul.f32 %v120_v46, %v120_v46  ;;  %v373_v0 = vmax.f32 %v245_v45, 1e-06  ;;  %v127_v17 = vld [vmem:[#allocation2 + $0x340] sm:$0xff] }
  0x66   :  { %v953_v27 = vpop.eup %952  ;;  %730 = vst [vmem:[#allocation5 + $0x218] sm:$0xff] %v542_v18  ;;  %v546_v28 = vmul.f32 0.6931472, %v951_v22  ;;  %978 = vlog2.f32 %v362_v9  ;;  %v249_v1 = vmul.f32 %v121_v51, %v121_v51  ;;  %v374_v5 = vmax.f32 %v246_v50, 1e-06  ;;  %v128_v22 = vld [vmem:[#allocation2 + $0x348] sm:$0xff] }
  0x67   :  { %v955_v32 = vpop.eup %954  ;;  %731 = vst [vmem:[#allocation5 + $0x220] sm:$0xff] %v544_v23  ;;  %v548_v33 = vmul.f32 0.6931472, %v953_v27  ;;  %980 = vlog2.f32 %v363_v14  ;;  %v250_v6 = vmul.f32 %v122_v56, %v122_v56  ;;  %v375_v10 = vmax.f32 %v247_v55, 1e-06  ;;  %v129_v27 = vld [vmem:[#allocation2 + $0x350] sm:$0xff] }
  0x68   :  { %v957_v37 = vpop.eup %956  ;;  %732 = vst [vmem:[#allocation5 + $0x228] sm:$0xff] %v546_v28  ;;  %v550_v38 = vmul.f32 0.6931472, %v955_v32  ;;  %982 = vlog2.f32 %v364_v19  ;;  %v251_v11 = vmul.f32 %v123_v61, %v123_v61  ;;  %v376_v15 = vmax.f32 %v248_v60, 1e-06  ;;  %v130_v32 = vld [vmem:[#allocation2 + $0x358] sm:$0xff] }
  0x69   :  { %v959_v42 = vpop.eup %958  ;;  %733 = vst [vmem:[#allocation5 + $0x230] sm:$0xff] %v548_v33  ;;  %v552_v43 = vmul.f32 0.6931472, %v957_v37  ;;  %984 = vlog2.f32 %v365_v24  ;;  %v252_v16 = vmul.f32 %v124_v2, %v124_v2  ;;  %v377_v20 = vmax.f32 %v249_v1, 1e-06  ;;  %v131_v37 = vld [vmem:[#allocation2 + $0x360] sm:$0xff] }
  0x6a   :  { %v961_v47 = vpop.eup %960  ;;  %734 = vst [vmem:[#allocation5 + $0x238] sm:$0xff] %v550_v38  ;;  %v554_v48 = vmul.f32 0.6931472, %v959_v42  ;;  %986 = vlog2.f32 %v366_v29  ;;  %v253_v21 = vmul.f32 %v125_v7, %v125_v7  ;;  %v378_v25 = vmax.f32 %v250_v6, 1e-06  ;;  %v132_v42 = vld [vmem:[#allocation2 + $0x368] sm:$0xff] }
  0x6b   :  { %v963_v52 = vpop.eup %962  ;;  %735 = vst [vmem:[#allocation5 + $0x240] sm:$0xff] %v552_v43  ;;  %v556_v53 = vmul.f32 0.6931472, %v961_v47  ;;  %988 = vlog2.f32 %v367_v34  ;;  %v254_v26 = vmul.f32 %v126_v12, %v126_v12  ;;  %v379_v30 = vmax.f32 %v251_v11, 1e-06  ;;  %v133_v47 = vld [vmem:[#allocation2 + $0x370] sm:$0xff] }
  0x6c   :  { %v965_v57 = vpop.eup %964  ;;  %736 = vst [vmem:[#allocation5 + $0x248] sm:$0xff] %v554_v48  ;;  %v558_v58 = vmul.f32 0.6931472, %v963_v52  ;;  %990 = vlog2.f32 %v368_v39  ;;  %v255_v31 = vmul.f32 %v127_v17, %v127_v17  ;;  %v380_v35 = vmax.f32 %v252_v16, 1e-06  ;;  %v134_v52 = vld [vmem:[#allocation2 + $0x378] sm:$0xff] }
  0x6d   :  { %v967_v62 = vpop.eup %966  ;;  %737 = vst [vmem:[#allocation5 + $0x250] sm:$0xff] %v556_v53  ;;  %v560_v63 = vmul.f32 0.6931472, %v965_v57  ;;  %992 = vlog2.f32 %v369_v44  ;;  %v256_v36 = vmul.f32 %v128_v22, %v128_v22  ;;  %v381_v40 = vmax.f32 %v253_v21, 1e-06  ;;  %v135_v57 = vld [vmem:[#allocation2 + $0x380] sm:$0xff] }
  0x6e   :  { %v969_v3 = vpop.eup %968  ;;  %738 = vst [vmem:[#allocation5 + $0x258] sm:$0xff] %v558_v58  ;;  %v562_v4 = vmul.f32 0.6931472, %v967_v62  ;;  %994 = vlog2.f32 %v370_v49  ;;  %v257_v41 = vmul.f32 %v129_v27, %v129_v27  ;;  %v382_v45 = vmax.f32 %v254_v26, 1e-06  ;;  %v136_v62 = vld [vmem:[#allocation2 + $0x388] sm:$0xff] }
  0x6f   :  { %v971_v8 = vpop.eup %970  ;;  %739 = vst [vmem:[#allocation5 + $0x260] sm:$0xff] %v560_v63  ;;  %v564_v9 = vmul.f32 0.6931472, %v969_v3  ;;  %996 = vlog2.f32 %v371_v54  ;;  %v258_v46 = vmul.f32 %v130_v32, %v130_v32  ;;  %v383_v50 = vmax.f32 %v255_v31, 1e-06  ;;  %v137_v3 = vld [vmem:[#allocation2 + $0x390] sm:$0xff] }
  0x70   :  { %v973_v13 = vpop.eup %972  ;;  %740 = vst [vmem:[#allocation5 + $0x268] sm:$0xff] %v562_v4  ;;  %v566_v14 = vmul.f32 0.6931472, %v971_v8  ;;  %998 = vlog2.f32 %v372_v59  ;;  %v259_v51 = vmul.f32 %v131_v37, %v131_v37  ;;  %v384_v55 = vmax.f32 %v256_v36, 1e-06  ;;  %v138_v8 = vld [vmem:[#allocation2 + $0x398] sm:$0xff] }
  0x71   :  { %v975_v18 = vpop.eup %974  ;;  %741 = vst [vmem:[#allocation5 + $0x270] sm:$0xff] %v564_v9  ;;  %v568_v19 = vmul.f32 0.6931472, %v973_v13  ;;  %1000 = vlog2.f32 %v373_v0  ;;  %v260_v56 = vmul.f32 %v132_v42, %v132_v42  ;;  %v385_v60 = vmax.f32 %v257_v41, 1e-06  ;;  %v139_v13 = vld [vmem:[#allocation2 + $0x3a0] sm:$0xff] }
  0x72   :  { %v977_v23 = vpop.eup %976  ;;  %742 = vst [vmem:[#allocation5 + $0x278] sm:$0xff] %v566_v14  ;;  %v570_v24 = vmul.f32 0.6931472, %v975_v18  ;;  %1002 = vlog2.f32 %v374_v5  ;;  %v261_v61 = vmul.f32 %v133_v47, %v133_v47  ;;  %v386_v1 = vmax.f32 %v258_v46, 1e-06  ;;  %v140_v18 = vld [vmem:[#allocation2 + $0x3a8] sm:$0xff] }
  0x73   :  { %v979_v28 = vpop.eup %978  ;;  %743 = vst [vmem:[#allocation5 + $0x280] sm:$0xff] %v568_v19  ;;  %v572_v29 = vmul.f32 0.6931472, %v977_v23  ;;  %1004 = vlog2.f32 %v375_v10  ;;  %v262_v2 = vmul.f32 %v134_v52, %v134_v52  ;;  %v387_v6 = vmax.f32 %v259_v51, 1e-06  ;;  %v141_v23 = vld [vmem:[#allocation2 + $0x3b0] sm:$0xff] }
  0x74   :  { %v981_v33 = vpop.eup %980  ;;  %744 = vst [vmem:[#allocation5 + $0x288] sm:$0xff] %v570_v24  ;;  %v574_v34 = vmul.f32 0.6931472, %v979_v28  ;;  %1006 = vlog2.f32 %v376_v15  ;;  %v263_v7 = vmul.f32 %v135_v57, %v135_v57  ;;  %v388_v11 = vmax.f32 %v260_v56, 1e-06  ;;  %v142_v28 = vld [vmem:[#allocation2 + $0x3b8] sm:$0xff] }
  0x75   :  { %v983_v38 = vpop.eup %982  ;;  %745 = vst [vmem:[#allocation5 + $0x290] sm:$0xff] %v572_v29  ;;  %v576_v39 = vmul.f32 0.6931472, %v981_v33  ;;  %1008 = vlog2.f32 %v377_v20  ;;  %v264_v12 = vmul.f32 %v136_v62, %v136_v62  ;;  %v389_v16 = vmax.f32 %v261_v61, 1e-06  ;;  %v143_v33 = vld [vmem:[#allocation2 + $0x3c0] sm:$0xff] }
  0x76   :  { %v985_v43 = vpop.eup %984  ;;  %746 = vst [vmem:[#allocation5 + $0x298] sm:$0xff] %v574_v34  ;;  %v578_v44 = vmul.f32 0.6931472, %v983_v38  ;;  %1010 = vlog2.f32 %v378_v25  ;;  %v265_v17 = vmul.f32 %v137_v3, %v137_v3  ;;  %v390_v21 = vmax.f32 %v262_v2, 1e-06  ;;  %v144_v38 = vld [vmem:[#allocation2 + $0x3c8] sm:$0xff] }
  0x77   :  { %v987_v48 = vpop.eup %986  ;;  %747 = vst [vmem:[#allocation5 + $0x2a0] sm:$0xff] %v576_v39  ;;  %v580_v49 = vmul.f32 0.6931472, %v985_v43  ;;  %1012 = vlog2.f32 %v379_v30  ;;  %v266_v22 = vmul.f32 %v138_v8, %v138_v8  ;;  %v391_v26 = vmax.f32 %v263_v7, 1e-06  ;;  %v145_v43 = vld [vmem:[#allocation2 + $0x3d0] sm:$0xff] }
  0x78   :  { %v989_v53 = vpop.eup %988  ;;  %748 = vst [vmem:[#allocation5 + $0x2a8] sm:$0xff] %v578_v44  ;;  %v582_v54 = vmul.f32 0.6931472, %v987_v48  ;;  %1014 = vlog2.f32 %v380_v35  ;;  %v267_v27 = vmul.f32 %v139_v13, %v139_v13  ;;  %v392_v31 = vmax.f32 %v264_v12, 1e-06  ;;  %v146_v48 = vld [vmem:[#allocation2 + $0x3d8] sm:$0xff] }
  0x79   :  { %v991_v58 = vpop.eup %990  ;;  %749 = vst [vmem:[#allocation5 + $0x2b0] sm:$0xff] %v580_v49  ;;  %v584_v59 = vmul.f32 0.6931472, %v989_v53  ;;  %1016 = vlog2.f32 %v381_v40  ;;  %v268_v32 = vmul.f32 %v140_v18, %v140_v18  ;;  %v393_v36 = vmax.f32 %v265_v17, 1e-06  ;;  %v147_v53 = vld [vmem:[#allocation2 + $0x3e0] sm:$0xff] }
  0x7a   :  { %v993_v63 = vpop.eup %992  ;;  %750 = vst [vmem:[#allocation5 + $0x2b8] sm:$0xff] %v582_v54  ;;  %v586_v0 = vmul.f32 0.6931472, %v991_v58  ;;  %1018 = vlog2.f32 %v382_v45  ;;  %v269_v37 = vmul.f32 %v141_v23, %v141_v23  ;;  %v394_v41 = vmax.f32 %v266_v22, 1e-06  ;;  %v148_v58 = vld [vmem:[#allocation2 + $0x3e8] sm:$0xff] }
  0x7b   :  { %v995_v4 = vpop.eup %994  ;;  %751 = vst [vmem:[#allocation5 + $0x2c0] sm:$0xff] %v584_v59  ;;  %v588_v5 = vmul.f32 0.6931472, %v993_v63  ;;  %1020 = vlog2.f32 %v383_v50  ;;  %v270_v42 = vmul.f32 %v142_v28, %v142_v28  ;;  %v395_v46 = vmax.f32 %v267_v27, 1e-06  ;;  %v149_v63 = vld [vmem:[#allocation2 + $0x3f0] sm:$0xff] }
  0x7c   :  { %v997_v9 = vpop.eup %996  ;;  %752 = vst [vmem:[#allocation5 + $0x2c8] sm:$0xff] %v586_v0  ;;  %v590_v10 = vmul.f32 0.6931472, %v995_v4  ;;  %1022 = vlog2.f32 %v384_v55  ;;  %v271_v47 = vmul.f32 %v143_v33, %v143_v33  ;;  %v396_v51 = vmax.f32 %v268_v32, 1e-06  ;;  %v150_v4 = vld [vmem:[#allocation2 + $0x3f8] sm:$0xff] }
  0x7d   :  { %v999_v14 = vpop.eup %998  ;;  %753 = vst [vmem:[#allocation5 + $0x2d0] sm:$0xff] %v588_v5  ;;  %v592_v15 = vmul.f32 0.6931472, %v997_v9  ;;  %1024 = vlog2.f32 %v385_v60  ;;  %v272_v52 = vmul.f32 %v144_v38, %v144_v38  ;;  %v397_v56 = vmax.f32 %v269_v37, 1e-06 }
  0x7e   :  { %v1001_v19 = vpop.eup %1000  ;;  %754 = vst [vmem:[#allocation5 + $0x2d8] sm:$0xff] %v590_v10  ;;  %v594_v20 = vmul.f32 0.6931472, %v999_v14  ;;  %1026 = vlog2.f32 %v386_v1  ;;  %v273_v57 = vmul.f32 %v145_v43, %v145_v43  ;;  %v398_v61 = vmax.f32 %v270_v42, 1e-06 }
  0x7f   :  { %v1003_v24 = vpop.eup %1002  ;;  %755 = vst [vmem:[#allocation5 + $0x2e0] sm:$0xff] %v592_v15  ;;  %v596_v25 = vmul.f32 0.6931472, %v1001_v19  ;;  %1028 = vlog2.f32 %v387_v6  ;;  %v274_v62 = vmul.f32 %v146_v48, %v146_v48  ;;  %v399_v2 = vmax.f32 %v271_v47, 1e-06 }
  0x80   :  { %v1005_v29 = vpop.eup %1004  ;;  %756 = vst [vmem:[#allocation5 + $0x2e8] sm:$0xff] %v594_v20  ;;  %v598_v30 = vmul.f32 0.6931472, %v1003_v24  ;;  %1030 = vlog2.f32 %v388_v11  ;;  %v275_v3 = vmul.f32 %v147_v53, %v147_v53  ;;  %v400_v7 = vmax.f32 %v272_v52, 1e-06 }
  0x81   :  { %v1007_v34 = vpop.eup %1006  ;;  %757 = vst [vmem:[#allocation5 + $0x2f0] sm:$0xff] %v596_v25  ;;  %v600_v35 = vmul.f32 0.6931472, %v1005_v29  ;;  %1032 = vlog2.f32 %v389_v16  ;;  %v276_v8 = vmul.f32 %v148_v58, %v148_v58  ;;  %v401_v11 = vmax.f32 %v273_v57, 1e-06 }
  0x82   :  { %v1009_v39 = vpop.eup %1008  ;;  %758 = vst [vmem:[#allocation5 + $0x2f8] sm:$0xff] %v598_v30  ;;  %v602_v40 = vmul.f32 0.6931472, %v1007_v34  ;;  %1034 = vlog2.f32 %v390_v21  ;;  %v277_v12 = vmul.f32 %v149_v63, %v149_v63  ;;  %v402_v15 = vmax.f32 %v274_v62, 1e-06 }
  0x83   :  { %v1011_v44 = vpop.eup %1010  ;;  %759 = vst [vmem:[#allocation5 + $0x300] sm:$0xff] %v600_v35  ;;  %v604_v45 = vmul.f32 0.6931472, %v1009_v39  ;;  %1036 = vlog2.f32 %v391_v26  ;;  %v278_v16 = vmul.f32 %v150_v4, %v150_v4  ;;  %v403_v19 = vmax.f32 %v275_v3, 1e-06 }
  0x84   :  { %v1013_v49 = vpop.eup %1012  ;;  %760 = vst [vmem:[#allocation5 + $0x308] sm:$0xff] %v602_v40  ;;  %v606_v50 = vmul.f32 0.6931472, %v1011_v44  ;;  %1038 = vlog2.f32 %v392_v31  ;;  %v404_v22 = vmax.f32 %v276_v8, 1e-06 }
  0x85   :  { %v1015_v54 = vpop.eup %1014  ;;  %761 = vst [vmem:[#allocation5 + $0x310] sm:$0xff] %v604_v45  ;;  %v608_v55 = vmul.f32 0.6931472, %v1013_v49  ;;  %1040 = vlog2.f32 %v393_v36  ;;  %v405_v25 = vmax.f32 %v277_v12, 1e-06 }
  0x86   :  { %v1017_v59 = vpop.eup %1016  ;;  %762 = vst [vmem:[#allocation5 + $0x318] sm:$0xff] %v606_v50  ;;  %v610_v60 = vmul.f32 0.6931472, %v1015_v54  ;;  %1042 = vlog2.f32 %v394_v41  ;;  %v406_v28 = vmax.f32 %v278_v16, 1e-06 }
  0x87   :  { %v1019_v0 = vpop.eup %1018  ;;  %763 = vst [vmem:[#allocation5 + $0x320] sm:$0xff] %v608_v55  ;;  %v612_v1 = vmul.f32 0.6931472, %v1017_v59  ;;  %1044 = vlog2.f32 %v395_v46 }
  0x88   :  { %v1021_v5 = vpop.eup %1020  ;;  %764 = vst [vmem:[#allocation5 + $0x328] sm:$0xff] %v610_v60  ;;  %v614_v6 = vmul.f32 0.6931472, %v1019_v0  ;;  %1046 = vlog2.f32 %v396_v51 }
  0x89   :  { %v1023_v9 = vpop.eup %1022  ;;  %765 = vst [vmem:[#allocation5 + $0x330] sm:$0xff] %v612_v1  ;;  %v616_v10 = vmul.f32 0.6931472, %v1021_v5  ;;  %1048 = vlog2.f32 %v397_v56 }
  0x8a   :  { %v1025_v13 = vpop.eup %1024  ;;  %766 = vst [vmem:[#allocation5 + $0x338] sm:$0xff] %v614_v6  ;;  %v618_v14 = vmul.f32 0.6931472, %v1023_v9  ;;  %1050 = vlog2.f32 %v398_v61 }
  0x8b   :  { %v1027_v17 = vpop.eup %1026  ;;  %767 = vst [vmem:[#allocation5 + $0x340] sm:$0xff] %v616_v10  ;;  %v620_v18 = vmul.f32 0.6931472, %v1025_v13  ;;  %1052 = vlog2.f32 %v399_v2 }
  0x8c   :  { %v1029_v20 = vpop.eup %1028  ;;  %768 = vst [vmem:[#allocation5 + $0x348] sm:$0xff] %v618_v14  ;;  %v622_v21 = vmul.f32 0.6931472, %v1027_v17  ;;  %1054 = vlog2.f32 %v400_v7 }
  0x8d   :  { %v1031_v23 = vpop.eup %1030  ;;  %769 = vst [vmem:[#allocation5 + $0x350] sm:$0xff] %v620_v18  ;;  %v624_v24 = vmul.f32 0.6931472, %v1029_v20  ;;  %1056 = vlog2.f32 %v401_v11 }
  0x8e   :  { %v1033_v26 = vpop.eup %1032  ;;  %770 = vst [vmem:[#allocation5 + $0x358] sm:$0xff] %v622_v21  ;;  %v626_v27 = vmul.f32 0.6931472, %v1031_v23  ;;  %1058 = vlog2.f32 %v402_v15 }
  0x8f   :  { %v1035_v29 = vpop.eup %1034  ;;  %771 = vst [vmem:[#allocation5 + $0x360] sm:$0xff] %v624_v24  ;;  %v628_v30 = vmul.f32 0.6931472, %v1033_v26  ;;  %1060 = vlog2.f32 %v403_v19 }
  0x90   :  { %v1037_v31 = vpop.eup %1036  ;;  %772 = vst [vmem:[#allocation5 + $0x368] sm:$0xff] %v626_v27  ;;  %v630_v32 = vmul.f32 0.6931472, %v1035_v29  ;;  %1062 = vlog2.f32 %v404_v22 }
  0x91   :  { %v1039_v33 = vpop.eup %1038  ;;  %773 = vst [vmem:[#allocation5 + $0x370] sm:$0xff] %v628_v30  ;;  %v632_v34 = vmul.f32 0.6931472, %v1037_v31  ;;  %1064 = vlog2.f32 %v405_v25 }
  0x92   :  { %v1041_v35 = vpop.eup %1040  ;;  %774 = vst [vmem:[#allocation5 + $0x378] sm:$0xff] %v630_v32  ;;  %v634_v36 = vmul.f32 0.6931472, %v1039_v33  ;;  %1066 = vlog2.f32 %v406_v28 }
  0x93   :  { %v1043_v37 = vpop.eup %1042  ;;  %775 = vst [vmem:[#allocation5 + $0x380] sm:$0xff] %v632_v34  ;;  %v636_v38 = vmul.f32 0.6931472, %v1041_v35 }
  0x94   :  { %v1045_v39 = vpop.eup %1044  ;;  %776 = vst [vmem:[#allocation5 + $0x388] sm:$0xff] %v634_v36  ;;  %v638_v40 = vmul.f32 0.6931472, %v1043_v37 }
  0x95   :  { %v1047_v41 = vpop.eup %1046  ;;  %777 = vst [vmem:[#allocation5 + $0x390] sm:$0xff] %v636_v38  ;;  %v640_v42 = vmul.f32 0.6931472, %v1045_v39 }
  0x96   :  { %v1049_v43 = vpop.eup %1048  ;;  %778 = vst [vmem:[#allocation5 + $0x398] sm:$0xff] %v638_v40  ;;  %v642_v44 = vmul.f32 0.6931472, %v1047_v41 }
  0x97   :  { %v1051_v45 = vpop.eup %1050  ;;  %779 = vst [vmem:[#allocation5 + $0x3a0] sm:$0xff] %v640_v42  ;;  %v644_v46 = vmul.f32 0.6931472, %v1049_v43 }
  0x98   :  { %v1053_v47 = vpop.eup %1052  ;;  %780 = vst [vmem:[#allocation5 + $0x3a8] sm:$0xff] %v642_v44  ;;  %v646_v48 = vmul.f32 0.6931472, %v1051_v45 }
  0x99   :  { %v1055_v49 = vpop.eup %1054  ;;  %781 = vst [vmem:[#allocation5 + $0x3b0] sm:$0xff] %v644_v46  ;;  %v648_v50 = vmul.f32 0.6931472, %v1053_v47 }
  0x9a   :  { %v1057_v51 = vpop.eup %1056  ;;  %782 = vst [vmem:[#allocation5 + $0x3b8] sm:$0xff] %v646_v48  ;;  %v650_v52 = vmul.f32 0.6931472, %v1055_v49 }
  0x9b   :  { %v1059_v53 = vpop.eup %1058  ;;  %783 = vst [vmem:[#allocation5 + $0x3c0] sm:$0xff] %v648_v50  ;;  %v652_v54 = vmul.f32 0.6931472, %v1057_v51 }
  0x9c   :  { %v1061_v55 = vpop.eup %1060  ;;  %784 = vst [vmem:[#allocation5 + $0x3c8] sm:$0xff] %v650_v52  ;;  %v654_v56 = vmul.f32 0.6931472, %v1059_v53 }
  0x9d   :  { %v1063_v57 = vpop.eup %1062  ;;  %785 = vst [vmem:[#allocation5 + $0x3d0] sm:$0xff] %v652_v54  ;;  %v656_v58 = vmul.f32 0.6931472, %v1061_v55 }
  0x9e   :  { %v1065_v59 = vpop.eup %1064  ;;  %786 = vst [vmem:[#allocation5 + $0x3d8] sm:$0xff] %v654_v56  ;;  %v658_v60 = vmul.f32 0.6931472, %v1063_v57 }
  0x9f   :  { %v1067_v61 = vpop.eup %1066  ;;  %787 = vst [vmem:[#allocation5 + $0x3e0] sm:$0xff] %v656_v58  ;;  %v660_v62 = vmul.f32 0.6931472, %v1065_v59 }
  0xa0   :  { %788 = vst [vmem:[#allocation5 + $0x3e8] sm:$0xff] %v658_v60  ;;  %v662_v63 = vmul.f32 0.6931472, %v1067_v61 }
  0xa1   :  { %789 = vst [vmem:[#allocation5 + $0x3f0] sm:$0xff] %v660_v62 }
  0xa2   :  { %790 = vst [vmem:[#allocation5 + $0x3f8] sm:$0xff] %v662_v63 }
  0xa3   :  { %1099 = shalt.err (!%p1096_p9)
}
  0xa4   :  { %802 = dma.vmem_to_hbm [thread:$0]  %s797_s13, 16384, %s1139_s1, [#allocation4], %s1113_s9, %s1113_s9, %s1114_s10  }
  0xa5   :  { %1110 = dma.done.wait [#allocation4], 16384  }
  0xa6   :  { %1111 = vsyncadd [#allocation4], 4294950912 }
  0xa7   :  { %806 = vsyncpa [#allocation3], 1 }
  0xa8   :  { %807 = vsyncpa [#allocation4], 1 }

</bundles_post_ra>
